<compile_context>
chip_gen: v7x
topology: tpu7x:2x2x1
jax: 0.10.0
libtpu: 0.0.40
codegen_flags: <defaults>
</compile_context>

<pallas_src>
import functools

import jax
import jax.numpy as jnp
from jax.experimental import pallas as pl
from jax.experimental.pallas import tpu as pltpu

EPS = 1e-5
_VMEM_LIMIT = 48 * 1024 * 1024  # explicit scoped-VMEM budget (headroom for v7x's 64 MiB)


def _round_up(x, m):
    return (x + m - 1) // m * m


def _cdiv(a, b):
    return -(-a // b)


# --------------------------------------------------------------------------- #
# Pass 1: conv (K shifted matmuls) + per-tile partial BN statistics
# --------------------------------------------------------------------------- #
def _conv_stats_kernel(x_ref, w_ref, y_ref, psum_ref, psumsq_ref, *, K, L_out):
    # x_ref:     (1, Lt + K - 1, C_in)   whole padded sequence of this batch (resident)
    # w_ref:     (K, C_in, C_out_pad)
    # y_ref:     (1, TL, C_out_pad)      conv output tile
    # psum_ref:  (1, 1, 1, C_out_pad)    per-tile sum over rows
    # psumsq_ref:(1, 1, 1, C_out_pad)    per-tile sum of squares over rows
    TL = y_ref.shape[1]
    C_out_pad = y_ref.shape[2]

    j = pl.program_id(1)
    start = pl.multiple_of(j * TL, TL)

    acc = jnp.zeros((TL, C_out_pad), jnp.float32)
    for k in range(K):  # K is small & static -> fully unrolled
        xk = x_ref[0, pl.ds(start + k, TL), :]                 # (TL, C_in)
        acc += jnp.dot(xk, w_ref[k], preferred_element_type=jnp.float32)

    # Mask rows beyond the true L_out (present only because of row-tile padding) so they
    # do not pollute the batch statistics.
    rows = j * TL + jax.lax.broadcasted_iota(jnp.int32, (TL, 1), 0)
    acc = jnp.where(rows < L_out, acc, 0.0)

    y_ref[0, :, :] = acc
    psum_ref[0, 0, :, :] = jnp.sum(acc, axis=0, keepdims=True)
    psumsq_ref[0, 0, :, :] = jnp.sum(acc * acc, axis=0, keepdims=True)


# --------------------------------------------------------------------------- #
# Pass 2: folded BatchNorm (scale/shift) + ReLU, lane-dense output
# --------------------------------------------------------------------------- #
def _bn_relu_kernel(y_ref, scale_ref, shift_ref, o_ref):
    # y_ref/o_ref: (1, TL, C_out_pad);  scale/shift: (1, C_out_pad)
    o_ref[0, :, :] = jnp.maximum(
        y_ref[0, :, :] * scale_ref[...] + shift_ref[...], 0.0
    ).astype(o_ref.dtype)


# --------------------------------------------------------------------------- #
# Wrapper
# --------------------------------------------------------------------------- #
@functools.partial(jax.jit, static_argnames=("kernel_size", "padding", "tile_l"))
def conv_block_forward(x, weight, bias, gamma, beta, *,
                       kernel_size=3, padding=1, tile_l=512):
    """x: (N, C_in, L) f32.  weight: (C_out, C_in, K).  Returns (N, C_out, L_out)."""
    N, C_in, L = x.shape
    C_out, _, K = weight.shape
    assert K == kernel_size
    L_out = L + 2 * padding - K + 1

    # ---- static tiling choices -------------------------------------------
    C_out_pad = _round_up(C_out, 128)          # lane-dense output channels
    L_r = _round_up(L_out, 8)
    TL = _round_up(min(tile_l, L_r), 8)        # row tile (multiple of 8 sublanes)
    nt = _cdiv(L_r, TL)
    Lt = nt * TL                               # padded row count per batch

    # ---- layout glue (cheap, ~1x x traffic; no K-times im2col) ------------
    x_cl = jnp.transpose(x, (0, 2, 1))                                   # (N, L, C_in)
    # conv zero-padding + extra tail zeros so every tile window is in bounds
    x_pad = jnp.pad(x_cl, ((0, 0), (padding, padding + (Lt - L_out)), (0, 0)))
    # x_pad: (N, Lt + K - 1, C_in)

    w_k = jnp.transpose(weight, (2, 1, 0))                               # (K, C_in, C_out)
    w_k = jnp.pad(w_k, ((0, 0), (0, 0), (0, C_out_pad - C_out)))
    gamma_p = jnp.pad(gamma.astype(jnp.float32), (0, C_out_pad - C_out))
    beta_p = jnp.pad(beta.astype(jnp.float32), (0, C_out_pad - C_out))
    # conv bias is exactly cancelled by train-mode BN mean subtraction -> not used.
    del bias

    # ---- pass 1: conv + partial stats --------------------------------------
    kern1 = functools.partial(_conv_stats_kernel, K=K, L_out=L_out)
    flops1 = 2 * N * Lt * K * C_in * C_out_pad
    bytes1 = 4 * (x_pad.size + w_k.size + N * Lt * C_out_pad + 2 * N * nt * C_out_pad)

    y, psum, psumsq = pl.pallas_call(
        kern1,
        grid=(N, nt),
        in_specs=[
            pl.BlockSpec((1, Lt + K - 1, C_in), lambda n, j: (n, 0, 0)),
            pl.BlockSpec((K, C_in, C_out_pad), lambda n, j: (0, 0, 0)),
        ],
        out_specs=[
            pl.BlockSpec((1, TL, C_out_pad), lambda n, j: (n, j, 0)),
            pl.BlockSpec((1, 1, 1, C_out_pad), lambda n, j: (n, j, 0, 0)),
            pl.BlockSpec((1, 1, 1, C_out_pad), lambda n, j: (n, j, 0, 0)),
        ],
        out_shape=[
            jax.ShapeDtypeStruct((N, Lt, C_out_pad), jnp.float32),
            jax.ShapeDtypeStruct((N, nt, 1, C_out_pad), jnp.float32),
            jax.ShapeDtypeStruct((N, nt, 1, C_out_pad), jnp.float32),
        ],
        compiler_params=pltpu.CompilerParams(
            dimension_semantics=("parallel", "parallel"),
            vmem_limit_bytes=_VMEM_LIMIT),
        cost_estimate=pl.CostEstimate(
            flops=flops1, transcendentals=0, bytes_accessed=bytes1),
    )(x_pad, w_k)

    # ---- tiny JAX epilogue: finalize global batch stats, fold BN into scale/shift
    count = jnp.float32(N * L_out)
    s = jnp.sum(psum, axis=(0, 1, 2))                 # (C_out_pad,)
    ss = jnp.sum(psumsq, axis=(0, 1, 2))              # (C_out_pad,)
    mean = s / count
    var = jnp.maximum(ss / count - mean * mean, 0.0)  # biased, train-mode BN
    scale = gamma_p * jax.lax.rsqrt(var + EPS)
    shift = beta_p - mean * scale
    scale2 = scale.reshape(1, C_out_pad)
    shift2 = shift.reshape(1, C_out_pad)

    # ---- pass 2: normalize + ReLU ------------------------------------------
    flops2 = 2 * N * Lt * C_out_pad
    bytes2 = 4 * (2 * N * Lt * C_out_pad + 2 * C_out_pad)

    out_p = pl.pallas_call(
        _bn_relu_kernel,
        grid=(N, nt),
        in_specs=[
            pl.BlockSpec((1, TL, C_out_pad), lambda n, j: (n, j, 0)),
            pl.BlockSpec((1, C_out_pad), lambda n, j: (0, 0)),
            pl.BlockSpec((1, C_out_pad), lambda n, j: (0, 0)),
        ],
        out_specs=pl.BlockSpec((1, TL, C_out_pad), lambda n, j: (n, j, 0)),
        out_shape=jax.ShapeDtypeStruct((N, Lt, C_out_pad), jnp.float32),
        compiler_params=pltpu.CompilerParams(
            dimension_semantics=("parallel", "parallel"),
            vmem_limit_bytes=_VMEM_LIMIT),
        cost_estimate=pl.CostEstimate(
            flops=flops2, transcendentals=0, bytes_accessed=bytes2),
    )(y, scale2, shift2)

    # strip row/channel padding, back to NCL
    out = out_p[:, :L_out, :C_out]                    # (N, L_out, C_out)
    return jnp.transpose(out, (0, 2, 1))              # (N, C_out, L_out)


# --------------------------------------------------------------------------- #
# Params / reference / test
# --------------------------------------------------------------------------- #
def init_params(key, in_channels, out_channels, kernel_size=3):
    """Deterministic init mimicking PyTorch Conv1d/BatchNorm1d defaults."""
    kw, kb = jax.random.split(key)
    fan_in = in_channels * kernel_size
    bound = 1.0 / jnp.sqrt(fan_in)
    weight = jax.random.uniform(
        kw, (out_channels, in_channels, kernel_size),
        minval=-bound, maxval=bound, dtype=jnp.float32)
    bias = jax.random.uniform(
        kb, (out_channels,), minval=-bound, maxval=bound, dtype=jnp.float32)
    gamma = jnp.ones((out_channels,), jnp.float32)   # BN weight
    beta = jnp.zeros((out_channels,), jnp.float32)   # BN bias
    return weight, bias, gamma, beta


def reference_forward(x, weight, bias, gamma, beta, padding=1):
    """Pure-JAX reference (Conv1d + training-mode BN + ReLU)."""
    y = jax.lax.conv_general_dilated(
        x, weight, window_strides=(1,), padding=[(padding, padding)],
        dimension_numbers=("NCH", "OIH", "NCH"))
    y = y + bias[None, :, None]
    mean = jnp.mean(y, axis=(0, 2), keepdims=True)
    var = jnp.mean((y - mean) ** 2, axis=(0, 2), keepdims=True)
    y = (y - mean) / jnp.sqrt(var + EPS)
    y = y * gamma[None, :, None] + beta[None, :, None]
    return jnp.maximum(y, 0.0)


if __name__ == "__main__":
    # Small shapes consistent with Conv1d: (batch, in_channels, seq_len)
    N, C_in, C_out, L = 2, 4, 8, 16
    key = jax.random.PRNGKey(0)
    kx, kp = jax.random.split(key)
    x = jax.random.normal(kx, (N, C_in, L), dtype=jnp.float32)
    weight, bias, gamma, beta = init_params(kp, C_in, C_out, kernel_size=3)

    out = conv_block_forward(x, weight, bias, gamma, beta,
                             kernel_size=3, padding=1)
    out = jax.block_until_ready(out)

    # sanity check against pure-JAX reference
    ref = reference_forward(x, weight, bias, gamma, beta, padding=1)
    assert out.shape == (N, C_out, L)
    assert jnp.allclose(out, ref, atol=2e-4, rtol=2e-4)

    print("KERNEL_OK")
</pallas_src>

<mosaic_0001>
module attributes {stable_mosaic.version = 11 : i64} {
  func.func @_conv_stats_kernel(%arg0: i32, %arg1: i32, %arg2: memref<1x18x4xf32, #tpu.memory_space<vmem>>, %arg3: memref<3x4x128xf32, #tpu.memory_space<vmem>>, %arg4: memref<1x16x128xf32, #tpu.memory_space<vmem>>, %arg5: memref<1x1x1x128xf32, #tpu.memory_space<vmem>>, %arg6: memref<1x1x1x128xf32, #tpu.memory_space<vmem>>) attributes {dimension_semantics = [#tpu.dimension_semantics<parallel>, #tpu.dimension_semantics<parallel>], iteration_bounds = array<i64: 2, 1>, scalar_prefetch = 0 : i64, scratch_operands = 0 : i64, tpu.core_type = #tpu.core_type<tc>, window_params = [{transform_indices = @transform_0, window_bounds = array<i64: 1, 18, 4>}, {pipeline_mode = #tpu.pipeline_mode<synchronous>, transform_indices = @transform_1, window_bounds = array<i64: 3, 4, 128>}, {transform_indices = @transform_2, window_bounds = array<i64: 1, 16, 128>}, {transform_indices = @transform_3, window_bounds = array<i64: 1, 1, 1, 128>}, {transform_indices = @transform_4, window_bounds = array<i64: 1, 1, 1, 128>}]} {
    %c16_i32 = arith.constant 16 : i32
    %0 = arith.muli %arg1, %c16_i32 : i32
    %1 = tpu.assume_multiple %0, 16 : i32
    %cst = arith.constant 0.000000e+00 : f32
    %2 = vector.broadcast %cst : f32 to vector<16x128xf32>
    %c0_i32 = arith.constant 0 : i32
    %3 = arith.addi %1, %c0_i32 : i32
    %c0 = arith.constant 0 : index
    %4 = arith.index_cast %3 : i32 to index
    %c0_0 = arith.constant 0 : index
    %5 = vector.load %arg2[%c0, %4, %c0_0] : memref<1x18x4xf32, #tpu.memory_space<vmem>>, vector<1x16x4xf32>
    %6 = vector.shape_cast %5 : vector<1x16x4xf32> to vector<16x4xf32>
    %c0_1 = arith.constant 0 : index
    %c0_2 = arith.constant 0 : index
    %c0_3 = arith.constant 0 : index
    %7 = vector.load %arg3[%c0_1, %c0_2, %c0_3] : memref<3x4x128xf32, #tpu.memory_space<vmem>>, vector<1x4x128xf32>
    %8 = vector.shape_cast %7 : vector<1x4x128xf32> to vector<4x128xf32>
    %cst_4 = arith.constant dense<0.000000e+00> : vector<16x128xf32>
    %9 = tpu.matmul %6, %8, %cst_4 {dimension_numbers = #tpu.dot_dimension_numbers<[1], [0], [0], [1], [0, 0, 1, 1], [], []>} : vector<16x4xf32>, vector<4x128xf32>, vector<16x128xf32> -> vector<16x128xf32>
    %10 = arith.addf %2, %9 : vector<16x128xf32>
    %c1_i32 = arith.constant 1 : i32
    %11 = arith.addi %1, %c1_i32 : i32
    %c0_5 = arith.constant 0 : index
    %12 = arith.index_cast %11 : i32 to index
    %c0_6 = arith.constant 0 : index
    %13 = vector.load %arg2[%c0_5, %12, %c0_6] : memref<1x18x4xf32, #tpu.memory_space<vmem>>, vector<1x16x4xf32>
    %14 = vector.shape_cast %13 : vector<1x16x4xf32> to vector<16x4xf32>
    %c1 = arith.constant 1 : index
    %c0_7 = arith.constant 0 : index
    %c0_8 = arith.constant 0 : index
    %15 = vector.load %arg3[%c1, %c0_7, %c0_8] : memref<3x4x128xf32, #tpu.memory_space<vmem>>, vector<1x4x128xf32>
    %16 = vector.shape_cast %15 : vector<1x4x128xf32> to vector<4x128xf32>
    %cst_9 = arith.constant dense<0.000000e+00> : vector<16x128xf32>
    %17 = tpu.matmul %14, %16, %cst_9 {dimension_numbers = #tpu.dot_dimension_numbers<[1], [0], [0], [1], [0, 0, 1, 1], [], []>} : vector<16x4xf32>, vector<4x128xf32>, vector<16x128xf32> -> vector<16x128xf32>
    %18 = arith.addf %10, %17 : vector<16x128xf32>
    %c2_i32 = arith.constant 2 : i32
    %19 = arith.addi %1, %c2_i32 : i32
    %c0_10 = arith.constant 0 : index
    %20 = arith.index_cast %19 : i32 to index
    %c0_11 = arith.constant 0 : index
    %21 = vector.load %arg2[%c0_10, %20, %c0_11] : memref<1x18x4xf32, #tpu.memory_space<vmem>>, vector<1x16x4xf32>
    %22 = vector.shape_cast %21 : vector<1x16x4xf32> to vector<16x4xf32>
    %c2 = arith.constant 2 : index
    %c0_12 = arith.constant 0 : index
    %c0_13 = arith.constant 0 : index
    %23 = vector.load %arg3[%c2, %c0_12, %c0_13] : memref<3x4x128xf32, #tpu.memory_space<vmem>>, vector<1x4x128xf32>
    %24 = vector.shape_cast %23 : vector<1x4x128xf32> to vector<4x128xf32>
    %cst_14 = arith.constant dense<0.000000e+00> : vector<16x128xf32>
    %25 = tpu.matmul %22, %24, %cst_14 {dimension_numbers = #tpu.dot_dimension_numbers<[1], [0], [0], [1], [0, 0, 1, 1], [], []>} : vector<16x4xf32>, vector<4x128xf32>, vector<16x128xf32> -> vector<16x128xf32>
    %26 = arith.addf %18, %25 : vector<16x128xf32>
    %c16_i32_15 = arith.constant 16 : i32
    %27 = arith.muli %arg1, %c16_i32_15 : i32
    %28 = tpu.iota {dimensions = array<i32: 0>} : vector<16x1xi32>
    %29 = vector.broadcast %27 : i32 to vector<16x1xi32>
    %30 = arith.addi %29, %28 : vector<16x1xi32>
    %c16_i32_16 = arith.constant 16 : i32
    %31 = vector.broadcast %c16_i32_16 : i32 to vector<16x1xi32>
    %32 = arith.cmpi slt, %30, %31 : vector<16x1xi32>
    %cst_17 = arith.constant 0.000000e+00 : f32
    %33 = vector.shape_cast %32 : vector<16x1xi1> to vector<16x1xi1>
    %34 = vector.broadcast %33 : vector<16x1xi1> to vector<16x128xi1>
    %35 = vector.broadcast %cst_17 : f32 to vector<16x128xf32>
    %36 = arith.select %34, %26, %35 : vector<16x128xi1>, vector<16x128xf32>
    %c0_18 = arith.constant 0 : index
    %c0_19 = arith.constant 0 : index
    %c0_20 = arith.constant 0 : index
    %37 = vector.load %arg4[%c0_18, %c0_19, %c0_20] : memref<1x16x128xf32, #tpu.memory_space<vmem>>, vector<1x16x128xf32>
    %38 = vector.shape_cast %37 : vector<1x16x128xf32> to vector<16x128xf32>
    %39 = vector.shape_cast %36 : vector<16x128xf32> to vector<1x16x128xf32>
    tpu.vector_store %arg4[%c0_18, %c0_19, %c0_20], %39 {strides = array<i32>} : memref<1x16x128xf32, #tpu.memory_space<vmem>>, vector<1x16x128xf32>,
    %cst_21 = arith.constant dense<0.000000e+00> : vector<128xf32>
    %40 = vector.multi_reduction <add>, %36, %cst_21 [0] : vector<16x128xf32> to vector<128xf32>
    %41 = vector.shape_cast %40 : vector<128xf32> to vector<1x128xf32>
    %c0_22 = arith.constant 0 : index
    %c0_23 = arith.constant 0 : index
    %c0_24 = arith.constant 0 : index
    %c0_25 = arith.constant 0 : index
    %42 = vector.load %arg5[%c0_22, %c0_23, %c0_24, %c0_25] : memref<1x1x1x128xf32, #tpu.memory_space<vmem>>, vector<1x1x1x128xf32>
    %43 = vector.shape_cast %42 : vector<1x1x1x128xf32> to vector<1x128xf32>
    %44 = vector.shape_cast %41 : vector<1x128xf32> to vector<1x1x1x128xf32>
    tpu.vector_store %arg5[%c0_22, %c0_23, %c0_24, %c0_25], %44 {strides = array<i32>} : memref<1x1x1x128xf32, #tpu.memory_space<vmem>>, vector<1x1x1x128xf32>,
    %45 = arith.mulf %36, %36 : vector<16x128xf32>
    %cst_26 = arith.constant dense<0.000000e+00> : vector<128xf32>
    %46 = vector.multi_reduction <add>, %45, %cst_26 [0] : vector<16x128xf32> to vector<128xf32>
    %47 = vector.shape_cast %46 : vector<128xf32> to vector<1x128xf32>
    %c0_27 = arith.constant 0 : index
    %c0_28 = arith.constant 0 : index
    %c0_29 = arith.constant 0 : index
    %c0_30 = arith.constant 0 : index
    %48 = vector.load %arg6[%c0_27, %c0_28, %c0_29, %c0_30] : memref<1x1x1x128xf32, #tpu.memory_space<vmem>>, vector<1x1x1x128xf32>
    %49 = vector.shape_cast %48 : vector<1x1x1x128xf32> to vector<1x128xf32>
    %50 = vector.shape_cast %47 : vector<1x128xf32> to vector<1x1x1x128xf32>
    tpu.vector_store %arg6[%c0_27, %c0_28, %c0_29, %c0_30], %50 {strides = array<i32>} : memref<1x1x1x128xf32, #tpu.memory_space<vmem>>, vector<1x1x1x128xf32>,
    return
  }
  func.func @transform_0(%arg0: i32, %arg1: i32) -> (i32, i32, i32) {
    %c0_i32 = arith.constant 0 : i32
    %c0_i32_0 = arith.constant 0 : i32
    %c0_i32_1 = arith.constant 0 : i32
    return %arg0, %c0_i32, %c0_i32_0 : i32, i32, i32
  }
  func.func @transform_1(%arg0: i32, %arg1: i32) -> (i32, i32, i32) {
    %c0_i32 = arith.constant 0 : i32
    %c0_i32_0 = arith.constant 0 : i32
    %c0_i32_1 = arith.constant 0 : i32
    %c0_i32_2 = arith.constant 0 : i32
    return %c0_i32, %c0_i32_0, %c0_i32_1 : i32, i32, i32
  }
  func.func @transform_2(%arg0: i32, %arg1: i32) -> (i32, i32, i32) {
    %c0_i32 = arith.constant 0 : i32
    %c0_i32_0 = arith.constant 0 : i32
    return %arg0, %arg1, %c0_i32 : i32, i32, i32
  }
  func.func @transform_3(%arg0: i32, %arg1: i32) -> (i32, i32, i32, i32) {
    %c0_i32 = arith.constant 0 : i32
    %c0_i32_0 = arith.constant 0 : i32
    %c0_i32_1 = arith.constant 0 : i32
    return %arg0, %arg1, %c0_i32, %c0_i32_0 : i32, i32, i32, i32
  }
  func.func @transform_4(%arg0: i32, %arg1: i32) -> (i32, i32, i32, i32) {
    %c0_i32 = arith.constant 0 : i32
    %c0_i32_0 = arith.constant 0 : i32
    %c0_i32_1 = arith.constant 0 : i32
    return %arg0, %arg1, %c0_i32, %c0_i32_0 : i32, i32, i32, i32
  }
}

module attributes {stable_mosaic.version = 11 : i64} {
  func.func @_bn_relu_kernel(%arg0: i32, %arg1: i32, %arg2: memref<1x16x128xf32, #tpu.memory_space<vmem>>, %arg3: memref<1x128xf32, #tpu.memory_space<vmem>>, %arg4: memref<1x128xf32, #tpu.memory_space<vmem>>, %arg5: memref<1x16x128xf32, #tpu.memory_space<vmem>>) attributes {dimension_semantics = [#tpu.dimension_semantics<parallel>, #tpu.dimension_semantics<parallel>], iteration_bounds = array<i64: 2, 1>, scalar_prefetch = 0 : i64, scratch_operands = 0 : i64, tpu.core_type = #tpu.core_type<tc>, window_params = [{transform_indices = @transform_0, window_bounds = array<i64: 1, 16, 128>}, {pipeline_mode = #tpu.pipeline_mode<synchronous>, transform_indices = @transform_1, window_bounds = array<i64: 1, 128>}, {pipeline_mode = #tpu.pipeline_mode<synchronous>, transform_indices = @transform_2, window_bounds = array<i64: 1, 128>}, {transform_indices = @transform_3, window_bounds = array<i64: 1, 16, 128>}]} {
    %c0 = arith.constant 0 : index
    %c0_0 = arith.constant 0 : index
    %c0_1 = arith.constant 0 : index
    %0 = vector.load %arg2[%c0, %c0_0, %c0_1] : memref<1x16x128xf32, #tpu.memory_space<vmem>>, vector<1x16x128xf32>
    %1 = vector.shape_cast %0 : vector<1x16x128xf32> to vector<16x128xf32>
    %c0_2 = arith.constant 0 : index
    %c0_3 = arith.constant 0 : index
    %2 = vector.load %arg3[%c0_2, %c0_3] : memref<1x128xf32, #tpu.memory_space<vmem>>, vector<1x128xf32>
    %3 = vector.broadcast %2 : vector<1x128xf32> to vector<16x128xf32>
    %4 = arith.mulf %1, %3 : vector<16x128xf32>
    %c0_4 = arith.constant 0 : index
    %c0_5 = arith.constant 0 : index
    %5 = vector.load %arg4[%c0_4, %c0_5] : memref<1x128xf32, #tpu.memory_space<vmem>>, vector<1x128xf32>
    %6 = vector.broadcast %5 : vector<1x128xf32> to vector<16x128xf32>
    %7 = arith.addf %4, %6 : vector<16x128xf32>
    %cst = arith.constant 0.000000e+00 : f32
    %8 = vector.broadcast %cst : f32 to vector<16x128xf32>
    %9 = arith.maximumf %7, %8 : vector<16x128xf32>
    %c0_6 = arith.constant 0 : index
    %c0_7 = arith.constant 0 : index
    %c0_8 = arith.constant 0 : index
    %10 = vector.load %arg5[%c0_6, %c0_7, %c0_8] : memref<1x16x128xf32, #tpu.memory_space<vmem>>, vector<1x16x128xf32>
    %11 = vector.shape_cast %10 : vector<1x16x128xf32> to vector<16x128xf32>
    %12 = vector.shape_cast %9 : vector<16x128xf32> to vector<1x16x128xf32>
    tpu.vector_store %arg5[%c0_6, %c0_7, %c0_8], %12 {strides = array<i32>} : memref<1x16x128xf32, #tpu.memory_space<vmem>>, vector<1x16x128xf32>,
    return
  }
  func.func @transform_0(%arg0: i32, %arg1: i32) -> (i32, i32, i32) {
    %c0_i32 = arith.constant 0 : i32
    %c0_i32_0 = arith.constant 0 : i32
    return %arg0, %arg1, %c0_i32 : i32, i32, i32
  }
  func.func @transform_1(%arg0: i32, %arg1: i32) -> (i32, i32) {
    %c0_i32 = arith.constant 0 : i32
    %c0_i32_0 = arith.constant 0 : i32
    %c0_i32_1 = arith.constant 0 : i32
    return %c0_i32, %c0_i32_0 : i32, i32
  }
  func.func @transform_2(%arg0: i32, %arg1: i32) -> (i32, i32) {
    %c0_i32 = arith.constant 0 : i32
    %c0_i32_0 = arith.constant 0 : i32
    %c0_i32_1 = arith.constant 0 : i32
    return %c0_i32, %c0_i32_0 : i32, i32
  }
  func.func @transform_3(%arg0: i32, %arg1: i32) -> (i32, i32, i32) {
    %c0_i32 = arith.constant 0 : i32
    %c0_i32_0 = arith.constant 0 : i32
    return %arg0, %arg1, %c0_i32 : i32, i32, i32
  }
}

</mosaic_0001>

<bundles_post_ra>
// kernel: conv_block_forward.3
= control target key start
LH: loop header
LB: loop body
LE: loop exit
PB: predicated region body
PF: predicated region fallthrough
CT: control target
= control target key end

     0   :  { %s404_s12 = smov 0   ;;  %s406_s13 = smov 0   ;;  %s436_s0 = inlined_call_operand.vmem [shape: f32[2,16,128], index: 0, kind: input, shape index: {}]   ;;  %s437_s1 = inlined_call_operand.vmem [shape: f32[1,128], index: 1, kind: input, shape index: {}]   ;;  %s438_s2 = inlined_call_operand.vmem [shape: f32[1,128], index: 2, kind: input, shape index: {}]   ;;  %s439_s3 = inlined_call_operand.vmem [shape: f32[2,16,128], index: 3, kind: output, shape index: {}]  }
   0x1   :  { %s408_s14 = smov 0  }
   0x2 LB: > { %s25_s15 = sadd.s32 1, %s378_s13  ;;  %p325_p0 = scmp.ge.s32.totalorder %s382_s14, 1  ;;  %s382_s14 = sphi %s408_s14, %s13_s14   ;;  %s378_s13 = sphi %s406_s13, %s441_s13   ;;  %s374_s12 = sphi %s404_s12, %s440_s12  }
   0x3   : > { %p27_p1 = scmp.ge.s32.totalorder %s25_s15, 2  ;;  %p158_p2 = scmp.lt.s32.totalorder %s382_s14, 3 }
   0x5   : > { %s443_s15 = smov (%p27_p1, %s25_s15), 0  ;;  %p159_p3 = pnand %p325_p0, %p158_p2 }
   0x6   : > { %p191_p4 = scmp.lt.s32.totalorder (!%p159_p3), %s374_s12, 1  ;;  %v330_v0 = vld [vmem:[%s437_s1] ss:$0 sm:$0xff] (!%p159_p3) }
   0x7   : > { %162 = sbr.rel (%p159_p3) target bundleno = 25 (0x19), region = 32  ;;  %v331_v3 = vld [vmem:[%s438_s2] ss:$0 sm:$0xff] (!%p159_p3) }
   0xe   : > { %s445_s12 = smov (!%p191_p4, %s374_s12), 1 }
   0xf   : > { %s334_s16 = sshll.u32 %s445_s12, 4 }
  0x10   : > { %s198_s21 = scalar_lea.vmem %s436_s0, %s334_s16  ;;  %s208_s26 = scalar_lea.vmem %s439_s3, %s334_s16 }
  0x11   : > { %v210_v1 = vld [vmem:[%s198_s21] sm:$0xff]  ;;  %v211_v2 = vld [vmem:[%s198_s21 + $0x8] sm:$0xff] }
  0x12   : > { %v219_v4 = vmul.f32 %v330_v0, %v210_v1  ;;  %v220_v5 = vmul.f32 %v330_v0, %v211_v2 }
  0x14   : > { %v228_v6 = vadd.f32 %v331_v3, %v219_v4  ;;  %v229_v7 = vadd.f32 %v331_v3, %v220_v5 }
  0x16   : > { %v230_v8 = vmax.f32 %v228_v6, 0.0  ;;  %v231_v9 = vmax.f32 %v229_v7, 0.0 }
  0x18   : > { %232 = vst [vmem:[%s208_s26] sm:$0xff] %v230_v8  ;;  %233 = vst [vmem:[%s208_s26 + $0x8] sm:$0xff] %v231_v9 }
  0x19 PF: > { %s13_s14 = sadd.s32 1, %s382_s14   ;;  %s440_s12 = smov %s378_s13 }
  0x1a   : > { %p10_p5 = scmp.ge.s32.totalorder %s13_s14, 4   ;;  %s441_s13 = smov %s443_s15 }
  0x1c   :  { %12 = sbr.rel (!%p10_p5) target bundleno = 2 (0x2), region = 62 }

// kernel: conv_block_forward.2
= control target key start
LH: loop header
LB: loop body
LE: loop exit
PB: predicated region body
PF: predicated region fallthrough
CT: control target
= control target key end

     0   :  { %s848_s15 = smov 0   ;;  %s850_s16 = smov 0   ;;  %s908_s0 = inlined_call_operand.vmem [shape: f32[2,18,4], index: 0, kind: input, shape index: {}]   ;;  %s909_s1 = inlined_call_operand.vmem [shape: f32[3,4,128], index: 1, kind: input, shape index: {}]   ;;  %s910_s2 = inlined_call_operand.vmem [shape: f32[2,16,128], index: 2, kind: output, shape index: {0}]   ;;  %s911_s3 = inlined_call_operand.vmem [shape: f32[2,1,1,128], index: 3, kind: output, shape index: {1}]   ;;  %s912_s4 = inlined_call_operand.vmem [shape: f32[2,1,1,128], index: 4, kind: output, shape index: {2}]  }
   0x1   :  { %s852_s17 = smov 0  }
   0x2 LB: > { %s27_s18 = sadd.s32 1, %s817_s16  ;;  %p724_p0 = scmp.ge.s32.totalorder %s821_s17, 1  ;;  %s821_s17 = sphi %s852_s17, %s15_s17   ;;  %s817_s16 = sphi %s850_s16, %s914_s16   ;;  %s813_s15 = sphi %s848_s15, %s913_s15  }
   0x3   : > { %p29_p1 = scmp.ge.s32.totalorder %s27_s18, 2  ;;  %p185_p2 = scmp.lt.s32.totalorder %s821_s17, 3 }
   0x5   : > { %s916_s18 = smov (%p29_p1, %s27_s18), 0  ;;  %p186_p3 = pnand %p724_p0, %p185_p2 }
   0x6   : > { %v258_v0 = vld [vmem:[%s909_s1] sm:$0xf] (!%p186_p3)  ;;  %vm272_vm0 = vcmask (!%p186_p3), 1043456   ;;  %p227_p4 = scmp.lt.s32.totalorder (!%p186_p3), %s813_s15, 1  ;;  %v739_v1 = vld [vmem:[%s909_s1 + $0x8] sm:$0xf] (!%p186_p3) }
   0x7   : > { %189 = sbr.rel (%p186_p3) target bundleno = 260 (0x104), region = 28  ;;  %760 = vmatprep.subr.msk.mxu0 (!%p186_p3), %vm272_vm0, %v258_v0  ;;  %v730_v2 = vld [vmem:[%s909_s1 + $0x4] sm:$0xf] (!%p186_p3)  ;;  %vm265_vm1 = vcmask (!%p186_p3), 31744  }
   0x8   : > { %761 = vmatpush3.msk.msra.mxu0 (!%p186_p3), %vm272_vm0, %v258_v0  ;;  %755 = vmatprep.subr.msk.mxu1 (!%p186_p3), %vm272_vm0, %v730_v2 }
   0x9   : > { %765 = vmatprep.subr.msk.mxu0 (!%p186_p3), %vm272_vm0, %v739_v1  ;;  %756 = vmatpush3.msk.msra.mxu1 (!%p186_p3), %vm272_vm0, %v730_v2 }
   0xe   : > { %s918_s15 = smov (!%p227_p4, %s813_s15), 1 }
   0xf   : > { %s774_s25 = smul.u32 24, %s918_s15  ;;  %s745_s29 = sshll.u32 %s918_s15, 4 }
  0x10   : > { %s240_s6 = scalar_lea.vmem %s910_s2, %s745_s29  ;;  %s247_s9 = scalar_lea.vmem %s911_s3, %s918_s15 }
  0x11   : > { %s231_s28 = scalar_lea.vmem %s908_s0, %s774_s25  ;;  %s253_s12 = scalar_lea.vmem %s912_s4, %s918_s15 }
  0x12   : > { %v256_v3 = vld [vmem:[%s231_s28] sm:$0xff]  ;;  %v257_v4 = vld [vmem:[%s231_s28 + $0x8] sm:$0xff] }
  0x13   : > { %v728_v5 = vld [vmem:[%s231_s28 + $0x1] sm:$0xff]  ;;  %762 = vmatprep.mubr.msk.f32.mxu0 %vm265_vm1, %v256_v3  ;;  %v729_v6 = vld [vmem:[%s231_s28 + $0x9] sm:$0xff] }
  0x14   : > { %757 = vmatprep.mubr.msk.f32.mxu1 %vm265_vm1, %v728_v5  ;;  %v737_v7 = vld [vmem:[%s231_s28 + $0x2] sm:$0xff]  ;;  %763 = vmatmul.mubr.msk.f32.vlgmr.msra.gmra.mrb[0].mxu0 %vm265_vm1, %v257_v4  ;;  %v738_v8 = vld [vmem:[%s231_s28 + $0xa] sm:$0xff] }
  0x15   : > { %758 = vmatmul.mubr.msk.f32.vlgmr.msra.gmra.mrb[0].mxu1 %vm265_vm1, %v729_v6  ;;  %766 = vmatpush3.msk.msra.mxu0 %vm272_vm0, %v739_v1 }
  0x16   : > { %767 = vmatprep.mubr.msk.f32.mxu0 %vm265_vm1, %v737_v7 }
  0x1c   : > { %768 = vmatmul.mubr.msk.f32.vlgmr.msra.gmra.mrb[0].mxu0 %vm265_vm1, %v738_v8 }
  0xe8   : > { %v759_v9 = vpop.f32.mrb[0].mxu1 }
  0xe9   : > { %v342_v10 = vpop.f32.mrb[1].mxu1 }
  0xef   : > { %v769_v11 = vpop.f32.mrb[0].mxu0 }
  0xf0   : > { %v770_v12 = vadd.f32 %v769_v11, %v759_v9  ;;  %v516_v13 = vpop.f32.mrb[1].mxu0 }
  0xf1   : > { %v771_v14 = vadd.f32 %v516_v13, %v342_v10 }
  0xf2   : > { %542 = vst [vmem:[%s240_s6 + $0x8] sm:$0xff] %v770_v12  ;;  %v552_v15 = vmul.f32 %v770_v12, %v770_v12 }
  0xf3   : > { %541 = vst [vmem:[%s240_s6] sm:$0xff] %v771_v14  ;;  %v543_v16 = vadd.f32 %v771_v14, %v770_v12  ;;  %v551_v17 = vmul.f32 %v771_v14, %v771_v14 }
  0xf5   : > { %v544_v18 = vrot.slane %v543_v16, 4  ;;  %v553_v19 = vadd.f32 %v552_v15, %v551_v17 }
  0xf7   : > { %v545_v20 = vadd.f32 %v544_v18, %v543_v16  ;;  %v554_v21 = vrot.slane %v553_v19, 4 }
  0xf9   : > { %v546_v22 = vrot.slane %v545_v20, 2  ;;  %v555_v23 = vadd.f32 %v554_v21, %v553_v19 }
  0xfb   : > { %v547_v24 = vadd.f32 %v546_v22, %v545_v20  ;;  %v556_v25 = vrot.slane %v555_v23, 2 }
  0xfd   : > { %v548_v26 = vrot.slane %v547_v24, 1  ;;  %v557_v27 = vadd.f32 %v556_v25, %v555_v23 }
  0xff   : > { %v549_v28 = vadd.f32 %v548_v26, %v547_v24  ;;  %v558_v29 = vrot.slane %v557_v27, 1 }
 0x101   : > { %550 = vst [vmem:[%s247_s9] sm:$0x1] %v549_v28  ;;  %v559_v30 = vadd.f32 %v558_v29, %v557_v27 }
 0x103   : > { %560 = vst [vmem:[%s253_s12] sm:$0x1] %v559_v30 }
 0x104 PF: > { %s15_s17 = sadd.s32 1, %s821_s17   ;;  %s913_s15 = smov %s817_s16 }
 0x105   : > { %p12_p5 = scmp.ge.s32.totalorder %s15_s17, 4   ;;  %s914_s16 = smov %s916_s18 }
 0x107   :  { %14 = sbr.rel (!%p12_p5) target bundleno = 2 (0x2), region = 87 }

</bundles_post_ra>
